<compile_context>
chip_gen: v6e
topology: v6e:2x2x1
jax: 0.10.0
libtpu: 0.0.40
codegen_flags: <defaults>
</compile_context>

<pallas_src>
import functools
import math

import jax
import jax.numpy as jnp
from jax import lax
from jax.experimental import pallas as pl
from jax.experimental.pallas import tpu as pltpu


# dot_general dimension numbers contracting dim 1 of BOTH operands:
#   (out, in) x (cols, in) -> (out, cols)  ==  W @ x^T   (x transpose fused into the MXU)
_NT_DIMS = (((1,), (1,)), ((), ()))


def _pinn_kernel(*refs, n_mid, chunk):
    if n_mid > 0:
        (x_ref, w_in_ref, b_in_ref, w_mid_ref, b_mid_ref,
         w_out_ref, b_out_ref, o_ref) = refs
    else:
        x_ref, w_in_ref, b_in_ref, w_out_ref, b_out_ref, o_ref = refs
        w_mid_ref = b_mid_ref = None

    block_n = o_ref.shape[-1]
    n_chunks = block_n // chunk

    # ---- Layer 1 over the whole block ---------------------------------------
    # x_ref is the raw (block_n, input_size) batch-major tile straight from HBM.
    # Contracting the feature dim of both operands (NT matmul, same form as q@k^T
    # in the stock flash-attention kernel) yields the feature-major activation
    # (neurons, block_n) without a host- or kernel-side transpose of x.
    h1 = lax.dot_general(w_in_ref[...], x_ref[...], _NT_DIMS,
                         preferred_element_type=jnp.float32)      # (neurons, block_n)

    b_in = b_in_ref[...]                                           # (neurons, 1)
    if n_mid > 0:
        w_mid = w_mid_ref[...]                                     # (n_mid, n, n)
        b_mid = b_mid_ref[...]                                     # (n_mid, n, 1)
    w_out = w_out_ref[...]                                         # (1, neurons)
    b_out = b_out_ref[...]                                         # (1, 1)

    # ---- Layers 2..L per lane chunk ------------------------------------------
    # Each chunk's activation ((neurons, chunk) f32) fits comfortably in vregs,
    # so the remaining layers never round-trip through VMEM.
    for c in range(n_chunks):
        lo = c * chunk
        h = jnp.maximum(h1[:, lo:lo + chunk] + b_in, 0.0)          # (neurons, chunk)
        for li in range(n_mid):
            h = jnp.dot(w_mid[li], h, preferred_element_type=jnp.float32) + b_mid[li]
            h = jnp.maximum(h, 0.0)
        o = jnp.dot(w_out, h, preferred_element_type=jnp.float32) + b_out   # (1, chunk)
        o_ref[:, lo:lo + chunk] = o.astype(o_ref.dtype)


def pinn_forward(x, params, *, chunk=256, max_block=4096, small_batch_threshold=512):
    """Fused PINN forward pass.

    x:      (batch, input_size) float32
    params: list of (W, b) in PyTorch nn.Linear layout, W: (out, in), b: (out,)
            (first layer (neurons, input_size), middle (neurons, neurons), last (1, neurons)).
    Returns (batch, 1), matching PyTorch's model(x).
    """
    batch, input_size = x.shape
    n_layers = len(params)
    assert n_layers >= 2, "PINN always has at least input layer + output layer"
    n_mid = n_layers - 2
    neurons = params[0][0].shape[0]

    # Tiny batches: a single grid step cannot amortize pallas_call / wrapper overhead;
    # XLA fuses this 4-layer MLP fine on its own.
    if batch <= small_batch_threshold:
        return pinn_reference(x, params)

    # Batch lives on the 128-lane axis.  Pick the largest block (<= max_block columns)
    # that still leaves >= 2 grid steps, so per-step overhead is amortized and on v7x
    # both TensorCores get work via the "parallel" batch axis.
    assert chunk % 128 == 0
    total_chunks = pl.cdiv(batch, chunk)
    cap_chunks = max(1, max_block // chunk)
    chunks_per_block = min(cap_chunks, max(1, total_chunks // 2))
    block_n = chunks_per_block * chunk
    padded = pl.cdiv(batch, block_n) * block_n

    # Zero-pad ragged batches (garbage columns are sliced off at the end).
    x_in = x if padded == batch else jnp.pad(x, ((0, padded - batch), (0, 0)))

    w_in = params[0][0]                        # (neurons, input_size)
    b_in = params[0][1].reshape(neurons, 1)
    w_out = params[-1][0]                      # (1, neurons)
    b_out = params[-1][1].reshape(1, 1)

    inputs = [x_in, w_in, b_in]
    in_specs = [
        pl.BlockSpec((block_n, input_size), lambda i: (i, 0)),   # batch-major tile, no host transpose
        pl.BlockSpec(w_in.shape, lambda i: (0, 0)),
        pl.BlockSpec(b_in.shape, lambda i: (0, 0)),
    ]
    if n_mid > 0:
        w_mid = jnp.stack([w for (w, _) in params[1:-1]])                       # (n_mid, n, n)
        b_mid = jnp.stack([b.reshape(neurons, 1) for (_, b) in params[1:-1]])   # (n_mid, n, 1)
        inputs += [w_mid, b_mid]
        in_specs += [
            pl.BlockSpec(w_mid.shape, lambda i: (0, 0, 0)),
            pl.BlockSpec(b_mid.shape, lambda i: (0, 0, 0)),
        ]
    inputs += [w_out, b_out]
    in_specs += [
        pl.BlockSpec(w_out.shape, lambda i: (0, 0)),
        pl.BlockSpec(b_out.shape, lambda i: (0, 0)),
    ]

    kernel = functools.partial(_pinn_kernel, n_mid=n_mid, chunk=chunk)

    out_t = pl.pallas_call(
        kernel,
        out_shape=jax.ShapeDtypeStruct((1, padded), x.dtype),
        grid_spec=pltpu.PrefetchScalarGridSpec(
            num_scalar_prefetch=0,
            grid=(padded // block_n,),
            in_specs=in_specs,
            # Lane-dense (1, block_n) output tile -> unmasked stores; keep the cheap
            # transpose/slice to (batch, 1) outside the kernel.
            out_specs=pl.BlockSpec((1, block_n), lambda i: (0, i)),
        ),
        compiler_params=pltpu.CompilerParams(
            dimension_semantics=("parallel",),
            vmem_limit_bytes=32 * 1024 * 1024,
        ),
    )(*inputs)

    # Back to PyTorch's (batch, 1) shape, dropping any batch padding.
    return jnp.transpose(out_t[:, :batch])


def init_pinn_params(key, input_size, hidden_layers, neurons):
    """Deterministic init mirroring nn.Linear's default U(-1/sqrt(fan_in), +1/sqrt(fan_in)).

    Weights in PyTorch layout (out_features, in_features), biases (out_features,).
    """
    dims = [input_size] + [neurons] * hidden_layers + [1]
    params = []
    for d_in, d_out in zip(dims[:-1], dims[1:]):
        key, kw, kb = jax.random.split(key, 3)
        bound = 1.0 / math.sqrt(d_in)
        w = jax.random.uniform(kw, (d_out, d_in), jnp.float32, -bound, bound)
        b = jax.random.uniform(kb, (d_out,), jnp.float32, -bound, bound)
        params.append((w, b))
    return params


def pinn_reference(x, params):
    """Pure-JAX reference matching the PyTorch forward exactly."""
    h = x
    for i, (w, b) in enumerate(params):
        h = h @ w.T + b
        if i != len(params) - 1:
            h = jnp.maximum(h, 0.0)
    return h


if __name__ == "__main__":
    # PINN-style sizes: input_size=4, hidden_layers=3, neurons=32.
    input_size, hidden_layers, neurons = 4, 3, 32

    key = jax.random.PRNGKey(0)
    key, kx1, kx2, kx3 = jax.random.split(key, 4)
    params = init_pinn_params(key, input_size, hidden_layers, neurons)

    # 1) Kernel path, aligned batch: 2 grid steps x 2 chunks/block at the defaults.
    x1 = jax.random.normal(kx1, (1024, input_size), jnp.float32)
    fwd = jax.jit(lambda xx: pinn_forward(xx, params, small_batch_threshold=0))
    out1 = jax.block_until_ready(fwd(x1))
    ref1 = pinn_reference(x1, params)
    assert out1.shape == (1024, 1), out1.shape
    assert jnp.allclose(out1, ref1, atol=1e-4, rtol=1e-5), "mismatch vs. reference (aligned)"

    # 2) Kernel path, ragged batch: exercises the zero-pad + slice path.
    x2 = jax.random.normal(kx2, (1000, input_size), jnp.float32)
    out2 = jax.block_until_ready(
        jax.jit(lambda xx: pinn_forward(xx, params, small_batch_threshold=0))(x2))
    ref2 = pinn_reference(x2, params)
    assert out2.shape == (1000, 1), out2.shape
    assert jnp.allclose(out2, ref2, atol=1e-4, rtol=1e-5), "mismatch vs. reference (ragged)"

    # 3) Small-batch dispatch: falls back to the fused-by-XLA path (kernel overhead
    #    would dominate a single tiny tile).
    x3 = jax.random.normal(kx3, (100, input_size), jnp.float32)
    out3 = jax.block_until_ready(jax.jit(lambda xx: pinn_forward(xx, params))(x3))
    assert out3.shape == (100, 1), out3.shape
    assert jnp.allclose(out3, pinn_reference(x3, params), atol=1e-5, rtol=1e-5)

    print("KERNEL_OK")
</pallas_src>

<mosaic_0001>
module attributes {stable_mosaic.version = 11 : i64} {
  func.func @_pinn_kernel(%arg0: i32, %arg1: memref<512x4xf32, #tpu.memory_space<vmem>>, %arg2: memref<32x4xf32, #tpu.memory_space<vmem>>, %arg3: memref<32x1xf32, #tpu.memory_space<vmem>>, %arg4: memref<2x32x32xf32, #tpu.memory_space<vmem>>, %arg5: memref<2x32x1xf32, #tpu.memory_space<vmem>>, %arg6: memref<1x32xf32, #tpu.memory_space<vmem>>, %arg7: memref<1x1xf32, #tpu.memory_space<vmem>>, %arg8: memref<1x512xf32, #tpu.memory_space<vmem>>) attributes {dimension_semantics = [#tpu.dimension_semantics<parallel>], iteration_bounds = array<i64: 2>, scalar_prefetch = 0 : i64, scratch_operands = 0 : i64, tpu.core_type = #tpu.core_type<tc>, window_params = [{transform_indices = @transform_0, window_bounds = array<i64: 512, 4>}, {pipeline_mode = #tpu.pipeline_mode<synchronous>, transform_indices = @transform_1, window_bounds = array<i64: 32, 4>}, {pipeline_mode = #tpu.pipeline_mode<synchronous>, transform_indices = @transform_2, window_bounds = array<i64: 32, 1>}, {pipeline_mode = #tpu.pipeline_mode<synchronous>, transform_indices = @transform_3, window_bounds = array<i64: 2, 32, 32>}, {pipeline_mode = #tpu.pipeline_mode<synchronous>, transform_indices = @transform_4, window_bounds = array<i64: 2, 32, 1>}, {pipeline_mode = #tpu.pipeline_mode<synchronous>, transform_indices = @transform_5, window_bounds = array<i64: 1, 32>}, {pipeline_mode = #tpu.pipeline_mode<synchronous>, transform_indices = @transform_6, window_bounds = array<i64: 1, 1>}, {transform_indices = @transform_7, window_bounds = array<i64: 1, 512>}]} {
    %c0 = arith.constant 0 : index
    %c0_0 = arith.constant 0 : index
    %0 = vector.load %arg2[%c0, %c0_0] : memref<32x4xf32, #tpu.memory_space<vmem>>, vector<32x4xf32>
    %c0_1 = arith.constant 0 : index
    %c0_2 = arith.constant 0 : index
    %1 = vector.load %arg1[%c0_1, %c0_2] : memref<512x4xf32, #tpu.memory_space<vmem>>, vector<512x4xf32>
    %cst = arith.constant dense<0.000000e+00> : vector<32x512xf32>
    %2 = tpu.matmul %0, %1, %cst {dimension_numbers = #tpu.dot_dimension_numbers<[1], [1], [0], [0], [0, 0, 1, 0], [], []>} : vector<32x4xf32>, vector<512x4xf32>, vector<32x512xf32> -> vector<32x512xf32>
    %c0_3 = arith.constant 0 : index
    %c0_4 = arith.constant 0 : index
    %3 = vector.load %arg3[%c0_3, %c0_4] : memref<32x1xf32, #tpu.memory_space<vmem>>, vector<32x1xf32>
    %c0_5 = arith.constant 0 : index
    %c0_6 = arith.constant 0 : index
    %c0_7 = arith.constant 0 : index
    %4 = vector.load %arg4[%c0_5, %c0_6, %c0_7] : memref<2x32x32xf32, #tpu.memory_space<vmem>>, vector<2x32x32xf32>
    %c0_8 = arith.constant 0 : index
    %c0_9 = arith.constant 0 : index
    %c0_10 = arith.constant 0 : index
    %5 = vector.load %arg5[%c0_8, %c0_9, %c0_10] : memref<2x32x1xf32, #tpu.memory_space<vmem>>, vector<2x32x1xf32>
    %c0_11 = arith.constant 0 : index
    %c0_12 = arith.constant 0 : index
    %6 = vector.load %arg6[%c0_11, %c0_12] : memref<1x32xf32, #tpu.memory_space<vmem>>, vector<1x32xf32>
    %c0_13 = arith.constant 0 : index
    %c0_14 = arith.constant 0 : index
    %7 = vector.load %arg7[%c0_13, %c0_14] : memref<1x1xf32, #tpu.memory_space<vmem>>, vector<1x1xf32>
    %8 = vector.extract_strided_slice %2 {offsets = [0, 0], sizes = [32, 256], strides = [1, 1]} : vector<32x512xf32> to vector<32x256xf32>
    %9 = vector.broadcast %3 : vector<32x1xf32> to vector<32x256xf32>
    %10 = arith.addf %8, %9 : vector<32x256xf32>
    %cst_15 = arith.constant 0.000000e+00 : f32
    %11 = vector.broadcast %cst_15 : f32 to vector<32x256xf32>
    %12 = arith.maximumf %10, %11 : vector<32x256xf32>
    %13 = vector.extract_strided_slice %4 {offsets = [0, 0, 0], sizes = [1, 32, 32], strides = [1, 1, 1]} : vector<2x32x32xf32> to vector<1x32x32xf32>
    %14 = vector.shape_cast %13 : vector<1x32x32xf32> to vector<32x32xf32>
    %cst_16 = arith.constant dense<0.000000e+00> : vector<32x256xf32>
    %15 = tpu.matmul %14, %12, %cst_16 {dimension_numbers = #tpu.dot_dimension_numbers<[1], [0], [0], [1], [0, 0, 1, 1], [], []>} : vector<32x32xf32>, vector<32x256xf32>, vector<32x256xf32> -> vector<32x256xf32>
    %16 = vector.extract_strided_slice %5 {offsets = [0, 0, 0], sizes = [1, 32, 1], strides = [1, 1, 1]} : vector<2x32x1xf32> to vector<1x32x1xf32>
    %17 = vector.shape_cast %16 : vector<1x32x1xf32> to vector<32x1xf32>
    %18 = vector.broadcast %17 : vector<32x1xf32> to vector<32x256xf32>
    %19 = arith.addf %15, %18 : vector<32x256xf32>
    %cst_17 = arith.constant 0.000000e+00 : f32
    %20 = vector.broadcast %cst_17 : f32 to vector<32x256xf32>
    %21 = arith.maximumf %19, %20 : vector<32x256xf32>
    %22 = vector.extract_strided_slice %4 {offsets = [1, 0, 0], sizes = [1, 32, 32], strides = [1, 1, 1]} : vector<2x32x32xf32> to vector<1x32x32xf32>
    %23 = vector.shape_cast %22 : vector<1x32x32xf32> to vector<32x32xf32>
    %cst_18 = arith.constant dense<0.000000e+00> : vector<32x256xf32>
    %24 = tpu.matmul %23, %21, %cst_18 {dimension_numbers = #tpu.dot_dimension_numbers<[1], [0], [0], [1], [0, 0, 1, 1], [], []>} : vector<32x32xf32>, vector<32x256xf32>, vector<32x256xf32> -> vector<32x256xf32>
    %25 = vector.extract_strided_slice %5 {offsets = [1, 0, 0], sizes = [1, 32, 1], strides = [1, 1, 1]} : vector<2x32x1xf32> to vector<1x32x1xf32>
    %26 = vector.shape_cast %25 : vector<1x32x1xf32> to vector<32x1xf32>
    %27 = vector.broadcast %26 : vector<32x1xf32> to vector<32x256xf32>
    %28 = arith.addf %24, %27 : vector<32x256xf32>
    %cst_19 = arith.constant 0.000000e+00 : f32
    %29 = vector.broadcast %cst_19 : f32 to vector<32x256xf32>
    %30 = arith.maximumf %28, %29 : vector<32x256xf32>
    %cst_20 = arith.constant dense<0.000000e+00> : vector<1x256xf32>
    %31 = tpu.matmul %6, %30, %cst_20 {dimension_numbers = #tpu.dot_dimension_numbers<[1], [0], [0], [1], [0, 0, 1, 1], [], []>} : vector<1x32xf32>, vector<32x256xf32>, vector<1x256xf32> -> vector<1x256xf32>
    %32 = vector.broadcast %7 : vector<1x1xf32> to vector<1x256xf32>
    %33 = arith.addf %31, %32 : vector<1x256xf32>
    %c0_21 = arith.constant 0 : index
    %c0_22 = arith.constant 0 : index
    %34 = vector.load %arg8[%c0_21, %c0_22] : memref<1x512xf32, #tpu.memory_space<vmem>>, vector<1x256xf32>
    tpu.vector_store %arg8[%c0_21, %c0_22], %33 {strides = array<i32>} : memref<1x512xf32, #tpu.memory_space<vmem>>, vector<1x256xf32>,
    %35 = vector.extract_strided_slice %2 {offsets = [0, 256], sizes = [32, 256], strides = [1, 1]} : vector<32x512xf32> to vector<32x256xf32>
    %36 = vector.broadcast %3 : vector<32x1xf32> to vector<32x256xf32>
    %37 = arith.addf %35, %36 : vector<32x256xf32>
    %cst_23 = arith.constant 0.000000e+00 : f32
    %38 = vector.broadcast %cst_23 : f32 to vector<32x256xf32>
    %39 = arith.maximumf %37, %38 : vector<32x256xf32>
    %40 = vector.extract_strided_slice %4 {offsets = [0, 0, 0], sizes = [1, 32, 32], strides = [1, 1, 1]} : vector<2x32x32xf32> to vector<1x32x32xf32>
    %41 = vector.shape_cast %40 : vector<1x32x32xf32> to vector<32x32xf32>
    %cst_24 = arith.constant dense<0.000000e+00> : vector<32x256xf32>
    %42 = tpu.matmul %41, %39, %cst_24 {dimension_numbers = #tpu.dot_dimension_numbers<[1], [0], [0], [1], [0, 0, 1, 1], [], []>} : vector<32x32xf32>, vector<32x256xf32>, vector<32x256xf32> -> vector<32x256xf32>
    %43 = vector.extract_strided_slice %5 {offsets = [0, 0, 0], sizes = [1, 32, 1], strides = [1, 1, 1]} : vector<2x32x1xf32> to vector<1x32x1xf32>
    %44 = vector.shape_cast %43 : vector<1x32x1xf32> to vector<32x1xf32>
    %45 = vector.broadcast %44 : vector<32x1xf32> to vector<32x256xf32>
    %46 = arith.addf %42, %45 : vector<32x256xf32>
    %cst_25 = arith.constant 0.000000e+00 : f32
    %47 = vector.broadcast %cst_25 : f32 to vector<32x256xf32>
    %48 = arith.maximumf %46, %47 : vector<32x256xf32>
    %49 = vector.extract_strided_slice %4 {offsets = [1, 0, 0], sizes = [1, 32, 32], strides = [1, 1, 1]} : vector<2x32x32xf32> to vector<1x32x32xf32>
    %50 = vector.shape_cast %49 : vector<1x32x32xf32> to vector<32x32xf32>
    %cst_26 = arith.constant dense<0.000000e+00> : vector<32x256xf32>
    %51 = tpu.matmul %50, %48, %cst_26 {dimension_numbers = #tpu.dot_dimension_numbers<[1], [0], [0], [1], [0, 0, 1, 1], [], []>} : vector<32x32xf32>, vector<32x256xf32>, vector<32x256xf32> -> vector<32x256xf32>
    %52 = vector.extract_strided_slice %5 {offsets = [1, 0, 0], sizes = [1, 32, 1], strides = [1, 1, 1]} : vector<2x32x1xf32> to vector<1x32x1xf32>
    %53 = vector.shape_cast %52 : vector<1x32x1xf32> to vector<32x1xf32>
    %54 = vector.broadcast %53 : vector<32x1xf32> to vector<32x256xf32>
    %55 = arith.addf %51, %54 : vector<32x256xf32>
    %cst_27 = arith.constant 0.000000e+00 : f32
    %56 = vector.broadcast %cst_27 : f32 to vector<32x256xf32>
    %57 = arith.maximumf %55, %56 : vector<32x256xf32>
    %cst_28 = arith.constant dense<0.000000e+00> : vector<1x256xf32>
    %58 = tpu.matmul %6, %57, %cst_28 {dimension_numbers = #tpu.dot_dimension_numbers<[1], [0], [0], [1], [0, 0, 1, 1], [], []>} : vector<1x32xf32>, vector<32x256xf32>, vector<1x256xf32> -> vector<1x256xf32>
    %59 = vector.broadcast %7 : vector<1x1xf32> to vector<1x256xf32>
    %60 = arith.addf %58, %59 : vector<1x256xf32>
    %c0_29 = arith.constant 0 : index
    %c256 = arith.constant 256 : index
    %61 = vector.load %arg8[%c0_29, %c256] : memref<1x512xf32, #tpu.memory_space<vmem>>, vector<1x256xf32>
    tpu.vector_store %arg8[%c0_29, %c256], %60 {strides = array<i32>} : memref<1x512xf32, #tpu.memory_space<vmem>>, vector<1x256xf32>,
    return
  }
  func.func @transform_0(%arg0: i32) -> (i32, i32) {
    %c0_i32 = arith.constant 0 : i32
    %c0_i32_0 = arith.constant 0 : i32
    return %arg0, %c0_i32 : i32, i32
  }
  func.func @transform_1(%arg0: i32) -> (i32, i32) {
    %c0_i32 = arith.constant 0 : i32
    %c0_i32_0 = arith.constant 0 : i32
    %c0_i32_1 = arith.constant 0 : i32
    return %c0_i32, %c0_i32_0 : i32, i32
  }
  func.func @transform_2(%arg0: i32) -> (i32, i32) {
    %c0_i32 = arith.constant 0 : i32
    %c0_i32_0 = arith.constant 0 : i32
    %c0_i32_1 = arith.constant 0 : i32
    return %c0_i32, %c0_i32_0 : i32, i32
  }
  func.func @transform_3(%arg0: i32) -> (i32, i32, i32) {
    %c0_i32 = arith.constant 0 : i32
    %c0_i32_0 = arith.constant 0 : i32
    %c0_i32_1 = arith.constant 0 : i32
    %c0_i32_2 = arith.constant 0 : i32
    return %c0_i32, %c0_i32_0, %c0_i32_1 : i32, i32, i32
  }
  func.func @transform_4(%arg0: i32) -> (i32, i32, i32) {
    %c0_i32 = arith.constant 0 : i32
    %c0_i32_0 = arith.constant 0 : i32
    %c0_i32_1 = arith.constant 0 : i32
    %c0_i32_2 = arith.constant 0 : i32
    return %c0_i32, %c0_i32_0, %c0_i32_1 : i32, i32, i32
  }
  func.func @transform_5(%arg0: i32) -> (i32, i32) {
    %c0_i32 = arith.constant 0 : i32
    %c0_i32_0 = arith.constant 0 : i32
    %c0_i32_1 = arith.constant 0 : i32
    return %c0_i32, %c0_i32_0 : i32, i32
  }
  func.func @transform_6(%arg0: i32) -> (i32, i32) {
    %c0_i32 = arith.constant 0 : i32
    %c0_i32_0 = arith.constant 0 : i32
    %c0_i32_1 = arith.constant 0 : i32
    return %c0_i32, %c0_i32_0 : i32, i32
  }
  func.func @transform_7(%arg0: i32) -> (i32, i32) {
    %c0_i32 = arith.constant 0 : i32
    %c0_i32_0 = arith.constant 0 : i32
    return %c0_i32, %arg0 : i32, i32
  }
}

</mosaic_0001>

<bundles_post_ra>
// kernel: _lambda_.1
= control target key start
LH: loop header
LB: loop body
LE: loop exit
PB: predicated region body
PF: predicated region fallthrough
CT: control target
= control target key end

     0   :  { %s2340_s0 = inlined_call_operand.vmem [shape: f32[1024,4], index: 0, kind: input, shape index: {}]   ;;  %s2341_s1 = inlined_call_operand.vmem [shape: f32[32,4], index: 1, kind: input, shape index: {}]   ;;  %s2342_s2 = inlined_call_operand.vmem [shape: f32[32,1], index: 2, kind: input, shape index: {}]   ;;  %s2343_s3 = inlined_call_operand.vmem [shape: f32[2,32,32], index: 3, kind: input, shape index: {}]   ;;  %s2344_s4 = inlined_call_operand.vmem [shape: f32[2,32,1], index: 4, kind: input, shape index: {}]   ;;  %s2345_s5 = inlined_call_operand.vmem [shape: f32[1,32], index: 5, kind: input, shape index: {}]   ;;  %s2346_s6 = inlined_call_operand.<no memory space> [shape: f32[1,1], index: 6, kind: input, shape index: {}]   ;;  %s2347_s7 = inlined_call_operand.hbm [shape: f32[1,1024], index: 7, kind: output, shape index: {}]  }
   0x1   :  { %v12_v0 = vstv %s2346_s6 }
   0x2   :  { %13 = vst [vmem:[#allocation2] sm:$0x1] %v12_v0 }
   0x3   :  { %14 = vsyncpa [#allocation4], 0 }
   0x4   :  { %16 = vsyncpa [#allocation4 + $0x1], 0  ;;  %s1866_s26 = smov 0   ;;  %s1868_s27 = smov 0  }
   0x5   :  { %s1870_s28 = smov 0   ;;  %s1872_s29 = smov 0  }
   0x6 LB: > { %s1529_s6 = sadd.s32 4294967295, %s1817_s29   ;;  %s1530_s30 = sadd.s32 4294967294, %s1817_s29   ;;  %s1817_s29 = sphi %s1872_s29, %s2355_s29   ;;  %s1813_s28 = sphi %s1870_s28, %s2354_s28   ;;  %s1809_s27 = sphi %s1868_s27, %s2353_s27   ;;  %s1805_s26 = sphi %s1866_s26, %s2352_s26  }
   0x7   : > { %s1889_s8 = sadd.s32 1, %s1817_s29   ;;  %s181_s9 = sadd.s32 1, %s1813_s28 }
   0x8   : > { %s178_s10 = ssub.s32 %s1817_s29, %s1889_s8  ;;  %p191_p0 = scmp.ne.s32.totalorder %s1813_s28, %s1809_s27 }
   0x9   : > { %p179_p1 = scmp.eq.s32.totalorder %s178_s10, 0  ;;  %p192_p2 = scmp.eq.s32.totalorder %s1529_s6, 1 }
   0xa   : > { %p197_p3 = scmp.ne.s32.totalorder %s1809_s27, %s1805_s26  ;;  %p198_p4 = scmp.eq.s32.totalorder %s1530_s30, 1 }
   0xb   : > { %s1899_s11 = scalar_select %p179_p1, %s1813_s28, %s181_s9  }
   0xc   : > { %p1901_p5 = por %p192_p2, %p191_p0  ;;  %p1905_p6 = por %p198_p4, %p197_p3 }
   0xd   : > { %p1533_p7 = scmp.ge.s32.totalorder %s1817_s29, 1  ;;  %p243_p8 = scmp.lt.s32.totalorder %s1817_s29, 3 }
   0xf   : > { %p244_p9 = pnand %p1533_p7, %p243_p8 }
  0x10   : > { %s1911_s14 = sshll.u32 (!%p244_p9), %s1529_s6, 6  ;;  %s272_s25 = sand.u32 (!%p244_p9), 1, %s1809_s27  }
  0x11   : > { %247 = sbr.rel (%p244_p9) target bundleno = 1201 (0x4b1), region = 48  ;;  %p276_p10 = scmp.lt.s32.totalorder (!%p244_p9), %s1911_s14, 127 }
  0x12   : > { %s1469_s17 = scalar_lea.hbm (!%p244_p9), %s2347_s7, %s1911_s14  ;;  %s1457_s18 = scalar_lea.sflag (!%p244_p9), [#allocation4], %s272_s25 }
  0x16   : > { %vm350_vm0 = vcmask 31744   ;;  %v1916_v1 = vld [vmem:[%s2341_s1] sm:$0xff]  ;;  %v736_v2 = vld [vmem:[%s2342_s2 + $0x18] sm:$0xff]  ;;  %v1819_v3 = vmov 0   ;;  %v734_v4 = vld [vmem:[%s2342_s2 + $0x8] sm:$0xff]  ;;  %s277_s21 = scalar_select %p276_p10, %s1911_s14, 127 }
  0x17   : > { %1665 = vmatprep.mubr.msk.f32.mxu0 %vm350_vm0, %v1916_v1  ;;  %1705 = vmatprep.mubr.msk.f32.mxu1 %vm350_vm0, %v1916_v1  ;;  %v735_v5 = vld [vmem:[%s2342_s2 + $0x10] sm:$0xff]  ;;  %v733_v6 = vld [vmem:[%s2342_s2] sm:$0xff]  ;;  %v748_v7 = vld [vmem:[%s2344_s4 + $0x18] sm:$0xff]  ;;  %vm811_vm1 = vcmask 261120  }
  0x18   : > { %1755 = vset.pattern.permute.xlu0 %v1819_v3  ;;  %1756 = vset.pattern.permute.xlu1 %v1819_v3  ;;  %s1536_s6 = sshll.u32 %s277_s21, 3  ;;  %v747_v8 = vld [vmem:[%s2344_s4 + $0x10] sm:$0xff]  ;;  %v746_v19 = vld [vmem:[%s2344_s4 + $0x8] sm:$0xff]  ;;  %v745_v20 = vld [vmem:[%s2344_s4] sm:$0xff] }
  0x19   : > { %772 = vperm.xlu0 %1755, %v736_v2   ;;  %762 = vperm.xlu1 %1756, %v734_v4   ;;  %s1939_s10 = scalar_lea.vmem %s2340_s0, %s1536_s6  ;;  %v752_v25 = vld [vmem:[%s2344_s4 + $0x38] sm:$0xff]  ;;  %v751_v26 = vld [vmem:[%s2344_s4 + $0x30] sm:$0xff]  ;;  %v750_v31 = vld [vmem:[%s2344_s4 + $0x28] sm:$0xff]  ;;  %s1534_s6 = sshll.u32 %s272_s25, 2 }
  0x1a   : > { %v317_v9 = vld [vmem:[%s1939_s10 + $0xf8] sm:$0xff]  ;;  %v316_v13 = vld [vmem:[%s1939_s10 + $0xf0] sm:$0xff]  ;;  %v315_v17 = vld [vmem:[%s1939_s10 + $0xe8] sm:$0xff]  ;;  %s2286_s30 = scalar_lea.vmem [#allocation3], %s1534_s6 }
  0x1b   : > { %v349_v10 = vld [vmem:[%s1939_s10 + $0x1f8] sm:$0xff]  ;;  %1633 = vmatprep.subr.msk.mxu0 %vm350_vm0, %v317_v9  ;;  %v348_v14 = vld [vmem:[%s1939_s10 + $0x1f0] sm:$0xff]  ;;  %v347_v18 = vld [vmem:[%s1939_s10 + $0x1e8] sm:$0xff]  ;;  %s1471_s9 = sshll.u32 %s2286_s30, 4  ;;  %s1472_s9 = int_to_ptr.vmem [resolvable:$true] %s1471_s9 }
  0x1c   : > { %v301_v11 = vld [vmem:[%s1939_s10 + $0x78] sm:$0xff]  ;;  %1673 = vmatprep.subr.msk.mxu1 %vm350_vm0, %v349_v10  ;;  %v300_v15 = vld [vmem:[%s1939_s10 + $0x70] sm:$0xff]  ;;  %v299_v21 = vld [vmem:[%s1939_s10 + $0x68] sm:$0xff]  ;;  %s1757_s19 = scalar_lea.vmem %s1472_s9, 64 }
  0x1d   : > { %767 = vperm.xlu0 %1755, %v735_v5   ;;  %757 = vperm.xlu1 %1756, %v733_v6   ;;  %v333_v12 = vld [vmem:[%s1939_s10 + $0x178] sm:$0xff]  ;;  %v332_v16 = vld [vmem:[%s1939_s10 + $0x170] sm:$0xff]  ;;  %v331_v22 = vld [vmem:[%s1939_s10 + $0x168] sm:$0xff]  ;;  %p1758_p11 = scmp.ne.s32.totalorder %s1472_s9, %s1757_s19 }
  0x1e   : > { %1634 = vmatpush3.xpose.msk.msra.mxu0 %vm350_vm0, %v301_v11  ;;  %1674 = vmatpush3.xpose.msk.msra.mxu1 %vm350_vm0, %v333_v12  ;;  %v314_v23 = vld [vmem:[%s1939_s10 + $0xe0] sm:$0xff]  ;;  %v313_v29 = vld [vmem:[%s1939_s10 + $0xd8] sm:$0xff]  ;;  %v312_v35 = vld [vmem:[%s1939_s10 + $0xd0] sm:$0xff] }
  0x1f   : > { %1635 = vmatprep.subr.msk.mxu0 %vm350_vm0, %v316_v13  ;;  %1675 = vmatprep.subr.msk.mxu1 %vm350_vm0, %v348_v14  ;;  %v346_v24 = vld [vmem:[%s1939_s10 + $0x1e0] sm:$0xff]  ;;  %v345_v30 = vld [vmem:[%s1939_s10 + $0x1d8] sm:$0xff]  ;;  %v344_v36 = vld [vmem:[%s1939_s10 + $0x1d0] sm:$0xff]  ;;  %p1759_p12 = pnand %p1758_p11, %p1901_p5 }
  0x20   : > { %v298_v27 = vld [vmem:[%s1939_s10 + $0x60] sm:$0xff]  ;;  %v297_v33 = vld [vmem:[%s1939_s10 + $0x58] sm:$0xff]  ;;  %v296_v38 = vld [vmem:[%s1939_s10 + $0x50] sm:$0xff] }
  0x21   : > { %808 = vperm.xlu0 %1755, %v748_v7   ;;  %803 = vperm.xlu1 %1756, %v747_v8   ;;  %v330_v28 = vld [vmem:[%s1939_s10 + $0x160] sm:$0xff]  ;;  %v329_v34 = vld [vmem:[%s1939_s10 + $0x158] sm:$0xff]  ;;  %v328_v39 = vld [vmem:[%s1939_s10 + $0x150] sm:$0xff]  ;;  %p1760_p13 = pneg %p1759_p12 }
  0x22   : > { %1636 = vmatpush3.xpose.msk.msra.mxu0 %vm350_vm0, %v300_v15  ;;  %1676 = vmatpush3.xpose.msk.msra.mxu1 %vm350_vm0, %v332_v16  ;;  %v749_v32 = vld [vmem:[%s2344_s4 + $0x20] sm:$0xff]  ;;  %v311_v40 = vld [vmem:[%s1939_s10 + $0xc8] sm:$0xff]  ;;  %v309_v48 = vld [vmem:[%s1939_s10 + $0xb8] sm:$0xff] }
  0x23   : > { %1637 = vmatprep.subr.msk.mxu0 %vm350_vm0, %v315_v17  ;;  %1677 = vmatprep.subr.msk.mxu1 %vm350_vm0, %v347_v18  ;;  %v754_v37 = vld [vmem:[#allocation2] sm:$0x1]  ;;  %v343_v41 = vld [vmem:[%s1939_s10 + $0x1c8] sm:$0xff]  ;;  %v341_v49 = vld [vmem:[%s1939_s10 + $0x1b8] sm:$0xff] }
  0x24   : > { %v295_v42 = vld [vmem:[%s1939_s10 + $0x48] sm:$0xff]  ;;  %v310_v44 = vld [vmem:[%s1939_s10 + $0xc0] sm:$0xff]  ;;  %v293_v50 = vld [vmem:[%s1939_s10 + $0x38] sm:$0xff] }
  0x25   : > { %798 = vperm.xlu0 %1755, %v746_v19   ;;  %793 = vperm.xlu1 %1756, %v745_v20   ;;  %v327_v43 = vld [vmem:[%s1939_s10 + $0x148] sm:$0xff]  ;;  %v342_v45 = vld [vmem:[%s1939_s10 + $0x1c0] sm:$0xff]  ;;  %v325_v51 = vld [vmem:[%s1939_s10 + $0x138] sm:$0xff]  ;;  %v1820_v19 = vmov 0.0  }
  0x26   : > { %1638 = vmatpush3.xpose.msk.msra.mxu0 %vm350_vm0, %v299_v21  ;;  %1678 = vmatpush3.xpose.msk.msra.mxu1 %vm350_vm0, %v331_v22  ;;  %v294_v46 = vld [vmem:[%s1939_s10 + $0x40] sm:$0xff]  ;;  %v308_v52 = vld [vmem:[%s1939_s10 + $0xb0] sm:$0xff]  ;;  %v307_v56 = vld [vmem:[%s1939_s10 + $0xa8] sm:$0xff] }
  0x27   : > { %1639 = vmatprep.subr.msk.mxu0 %vm350_vm0, %v314_v23  ;;  %1679 = vmatprep.subr.msk.mxu1 %vm350_vm0, %v346_v24  ;;  %v326_v47 = vld [vmem:[%s1939_s10 + $0x140] sm:$0xff]  ;;  %v340_v53 = vld [vmem:[%s1939_s10 + $0x1b0] sm:$0xff]  ;;  %v339_v57 = vld [vmem:[%s1939_s10 + $0x1a8] sm:$0xff] }
  0x28   : > { %v292_v54 = vld [vmem:[%s1939_s10 + $0x30] sm:$0xff]  ;;  %v291_v58 = vld [vmem:[%s1939_s10 + $0x28] sm:$0xff]  ;;  %v306_v60 = vld [vmem:[%s1939_s10 + $0xa0] sm:$0xff] }
  0x29   : > { %938 = vperm.xlu0 %1755, %v752_v25   ;;  %933 = vperm.xlu1 %1756, %v751_v26   ;;  %v324_v55 = vld [vmem:[%s1939_s10 + $0x130] sm:$0xff]  ;;  %v323_v59 = vld [vmem:[%s1939_s10 + $0x128] sm:$0xff]  ;;  %v338_v61 = vld [vmem:[%s1939_s10 + $0x1a0] sm:$0xff] }
  0x2a   : > { %1640 = vmatpush3.xpose.msk.msra.mxu0 %vm350_vm0, %v298_v27  ;;  %1680 = vmatpush3.xpose.msk.msra.mxu1 %vm350_vm0, %v330_v28  ;;  %v290_v62 = vld [vmem:[%s1939_s10 + $0x20] sm:$0xff]  ;;  %v305_v0 = vld [vmem:[%s1939_s10 + $0x98] sm:$0xff]  ;;  %v304_v5 = vld [vmem:[%s1939_s10 + $0x90] sm:$0xff] }
  0x2b   : > { %1641 = vmatprep.subr.msk.mxu0 %vm350_vm0, %v313_v29  ;;  %1681 = vmatprep.subr.msk.mxu1 %vm350_vm0, %v345_v30  ;;  %v322_v63 = vld [vmem:[%s1939_s10 + $0x120] sm:$0xff]  ;;  %v337_v2 = vld [vmem:[%s1939_s10 + $0x198] sm:$0xff]  ;;  %v336_v6 = vld [vmem:[%s1939_s10 + $0x190] sm:$0xff] }
  0x2c   : > { %v289_v3 = vld [vmem:[%s1939_s10 + $0x18] sm:$0xff]  ;;  %v288_v7 = vld [vmem:[%s1939_s10 + $0x10] sm:$0xff]  ;;  %v303_v9 = vld [vmem:[%s1939_s10 + $0x88] sm:$0xff] }
  0x2d   : > { %928 = vperm.xlu0 %1755, %v750_v31   ;;  %923 = vperm.xlu1 %1756, %v749_v32   ;;  %v321_v4 = vld [vmem:[%s1939_s10 + $0x118] sm:$0xff]  ;;  %v320_v8 = vld [vmem:[%s1939_s10 + $0x110] sm:$0xff]  ;;  %v335_v10 = vld [vmem:[%s1939_s10 + $0x188] sm:$0xff] }
  0x2e   : > { %1642 = vmatpush3.xpose.msk.msra.mxu0 %vm350_vm0, %v297_v33  ;;  %1682 = vmatpush3.xpose.msk.msra.mxu1 %vm350_vm0, %v329_v34  ;;  %v287_v11 = vld [vmem:[%s1939_s10 + $0x8] sm:$0xff]  ;;  %v302_v13 = vld [vmem:[%s1939_s10 + $0x80] sm:$0xff]  ;;  %v284_v18 = vld [vmem:[%s2341_s1 + $0x10] sm:$0xff] }
  0x2f   : > { %1643 = vmatprep.subr.msk.mxu0 %vm350_vm0, %v312_v35  ;;  %1683 = vmatprep.subr.msk.mxu1 %vm350_vm0, %v344_v36  ;;  %v319_v12 = vld [vmem:[%s1939_s10 + $0x108] sm:$0xff]  ;;  %v334_v14 = vld [vmem:[%s1939_s10 + $0x180] sm:$0xff] }
  0x30   : > { %v286_v15 = vld [vmem:[%s1939_s10] sm:$0xff]  ;;  %v283_v17 = vld [vmem:[%s2341_s1 + $0x8] sm:$0xff] }
  0x31   : > { %1052 = vperm.xlu0 %1755, %v754_v37   ;;  %v318_v16 = vld [vmem:[%s1939_s10 + $0x100] sm:$0xff]  ;;  %s1822_s10 = smov [#allocation3]  }
  0x32   : > { %1644 = vmatpush3.xpose.msk.msra.mxu0 %vm350_vm0, %v296_v38  ;;  %1684 = vmatpush3.xpose.msk.msra.mxu1 %vm350_vm0, %v328_v39  ;;  %s1761_s20 = sshll.u32 %s1822_s10, 4  ;;  %s1762_s20 = int_to_ptr.vmem [resolvable:$false] %s1761_s20 }
  0x33   : > { %1645 = vmatprep.subr.msk.mxu0 %vm350_vm0, %v311_v40  ;;  %1685 = vmatprep.subr.msk.mxu1 %vm350_vm0, %v343_v41  ;;  %s1763_s21 = scalar_lea.vmem %s1762_s20, 128  ;;  %p1764_p0 = scmp.lt.s32.totalorder %s1472_s9, %s1762_s20 }
  0x34   : > { %p1765_p1 = scmp.lt.s32.totalorder %s1763_s21, %s1757_s19 }
  0x36   : > { %1646 = vmatpush3.xpose.msk.msra.mxu0 %vm350_vm0, %v295_v42  ;;  %1686 = vmatpush3.xpose.msk.msra.mxu1 %vm350_vm0, %v327_v43  ;;  %p1766_p2 = por %p1765_p1, %p1764_p0 }
  0x37   : > { %1647 = vmatprep.subr.msk.mxu0 %vm350_vm0, %v310_v44  ;;  %1687 = vmatprep.subr.msk.mxu1 %vm350_vm0, %v342_v45 }
  0x38   : > { %p1767_p3 = pnand %p1766_p2, %p1760_p13 }
  0x3a   : > { %1648 = vmatpush3.xpose.msk.msra.mxu0 %vm350_vm0, %v294_v46  ;;  %1688 = vmatpush3.xpose.msk.msra.mxu1 %vm350_vm0, %v326_v47 }
  0x3b   : > { %1649 = vmatprep.subr.msk.mxu0 %vm350_vm0, %v309_v48  ;;  %1689 = vmatprep.subr.msk.mxu1 %vm350_vm0, %v341_v49  ;;  %v2139_v48 = vld [vmem:[%s2343_s3] sm:$0xff]  ;;  %v2147_v49 = vld [vmem:[%s2343_s3 + $0x8] sm:$0xff] }
  0x3e   : > { %1650 = vmatpush3.xpose.msk.msra.mxu0 %vm350_vm0, %v293_v50  ;;  %1690 = vmatpush3.xpose.msk.msra.mxu1 %vm350_vm0, %v325_v51  ;;  %v2155_v50 = vld [vmem:[%s2343_s3 + $0x10] sm:$0xff]  ;;  %v2163_v51 = vld [vmem:[%s2343_s3 + $0x18] sm:$0xff] }
  0x3f   : > { %1651 = vmatprep.subr.msk.mxu0 %vm350_vm0, %v308_v52  ;;  %1691 = vmatprep.subr.msk.mxu1 %vm350_vm0, %v340_v53 }
  0x42   : > { %1652 = vmatpush3.xpose.msk.msra.mxu0 %vm350_vm0, %v292_v54  ;;  %1692 = vmatpush3.xpose.msk.msra.mxu1 %vm350_vm0, %v324_v55 }
  0x43   : > { %1653 = vmatprep.subr.msk.mxu0 %vm350_vm0, %v307_v56  ;;  %1693 = vmatprep.subr.msk.mxu1 %vm350_vm0, %v339_v57 }
  0x46   : > { %1654 = vmatpush3.xpose.msk.msra.mxu0 %vm350_vm0, %v291_v58  ;;  %1694 = vmatpush3.xpose.msk.msra.mxu1 %vm350_vm0, %v323_v59 }
  0x47   : > { %1655 = vmatprep.subr.msk.mxu0 %vm350_vm0, %v306_v60  ;;  %1695 = vmatprep.subr.msk.mxu1 %vm350_vm0, %v338_v61 }
  0x4a   : > { %1656 = vmatpush3.xpose.msk.msra.mxu0 %vm350_vm0, %v290_v62  ;;  %1696 = vmatpush3.xpose.msk.msra.mxu1 %vm350_vm0, %v322_v63 }
  0x4b   : > { %1657 = vmatprep.subr.msk.mxu0 %vm350_vm0, %v305_v0  ;;  %1697 = vmatprep.subr.msk.mxu1 %vm350_vm0, %v337_v2 }
  0x4e   : > { %1658 = vmatpush3.xpose.msk.msra.mxu0 %vm350_vm0, %v289_v3  ;;  %1698 = vmatpush3.xpose.msk.msra.mxu1 %vm350_vm0, %v321_v4 }
  0x4f   : > { %1659 = vmatprep.subr.msk.mxu0 %vm350_vm0, %v304_v5  ;;  %1699 = vmatprep.subr.msk.mxu1 %vm350_vm0, %v336_v6 }
  0x52   : > { %1660 = vmatpush3.xpose.msk.msra.mxu0 %vm350_vm0, %v288_v7  ;;  %1700 = vmatpush3.xpose.msk.msra.mxu1 %vm350_vm0, %v320_v8 }
  0x53   : > { %1661 = vmatprep.subr.msk.mxu0 %vm350_vm0, %v303_v9  ;;  %1701 = vmatprep.subr.msk.mxu1 %vm350_vm0, %v335_v10 }
  0x56   : > { %1662 = vmatpush3.xpose.msk.msra.mxu0 %vm350_vm0, %v287_v11  ;;  %1702 = vmatpush3.xpose.msk.msra.mxu1 %vm350_vm0, %v319_v12 }
  0x57   : > { %1663 = vmatprep.subr.msk.mxu0 %vm350_vm0, %v302_v13  ;;  %1703 = vmatprep.subr.msk.mxu1 %vm350_vm0, %v334_v14 }
  0x5a   : > { %1664 = vmatpush3.xpose.msk.msra.mxu0 %vm350_vm0, %v286_v15  ;;  %1704 = vmatpush3.xpose.msk.msra.mxu1 %vm350_vm0, %v318_v16 }
  0x5d   : > { %1666 = vmatmul.mubr.msk.f32.vlgmr.msra.gmra.mxu0 %vm350_vm0, %v1916_v1  ;;  %1706 = vmatmul.mubr.msk.f32.vlgmr.msra.gmra.mxu1 %vm350_vm0, %v1916_v1  ;;  %v285_v1 = vld [vmem:[%s2341_s1 + $0x18] sm:$0xff] }
  0x5e   : > { %1667 = vmatprep.mubr.msk.f32.mxu0 %vm350_vm0, %v283_v17  ;;  %1707 = vmatprep.mubr.msk.f32.mxu1 %vm350_vm0, %v283_v17 }
  0x61   : > { %1668 = vmatmul.mubr.msk.f32.gmra.mxu0 %vm350_vm0, %v283_v17  ;;  %1708 = vmatmul.mubr.msk.f32.gmra.mxu1 %vm350_vm0, %v283_v17 }
  0x62   : > { %1669 = vmatprep.mubr.msk.f32.mxu0 %vm350_vm0, %v284_v18  ;;  %1709 = vmatprep.mubr.msk.f32.mxu1 %vm350_vm0, %v284_v18 }
  0x65   : > { %1670 = vmatmul.mubr.msk.f32.gmra.mxu0 %vm350_vm0, %v284_v18  ;;  %1710 = vmatmul.mubr.msk.f32.gmra.mxu1 %vm350_vm0, %v284_v18 }
  0x66   : > { %1671 = vmatprep.mubr.msk.f32.mxu0 %vm350_vm0, %v285_v1  ;;  %1711 = vmatprep.mubr.msk.f32.mxu1 %vm350_vm0, %v285_v1 }
  0x69   : > { %1672 = vmatmul.mubr.msk.f32.gmra.mxu0 %vm350_vm0, %v285_v1  ;;  %1712 = vmatmul.mubr.msk.f32.gmra.mxu1 %vm350_vm0, %v285_v1 }
  0x6a   : > { %888 = vmatprep.mubr.f32.mxu0 %v1820_v19  ;;  %1017 = vmatprep.mubr.f32.mxu1 %v1820_v19 }
  0x94   : > { %v2120_v24 = vpop.permute.xlu0 %772  ;;  %v2122_v27 = vpop.permute.xlu1 %762 }
  0x98   : > { %v2124_v29 = vpop.permute.xlu0 %767  ;;  %v2130_v35 = vpop.permute.xlu1 %757 }
  0x9c   : > { %v2168_v62 = vpop.permute.xlu0 %808  ;;  %v2170_v2 = vpop.permute.xlu1 %803 }
  0xa0   : > { %v2175_v9 = vpop.permute.xlu0 %798  ;;  %v2179_v13 = vpop.permute.xlu1 %793 }
 0x11d   : > { %v621_v20 = vpop.f32.mrf.mxu0  ;;  %v710_v52 = vpop.f32.mrf.mxu1 }
 0x11e   : > { %v775_v42 = vadd.f32 %v2130_v35, %v621_v20 }
 0x11f   : > { %v623_v21 = vpop.f32.mrf.mxu0  ;;  %v712_v53 = vpop.f32.mrf.mxu1 }
 0x120   : > { %v776_v40 = vadd.f32 %v2130_v35, %v623_v21  ;;  %v783_v47 = vmax.f32 %v775_v42, 0.0 }
 0x121   : > { %v627_v22 = vpop.f32.mrf.mxu0  ;;  %v716_v54 = vpop.f32.mrf.mxu1 }
 0x122   : > { %v777_v38 = vadd.f32 %v2122_v27, %v627_v22  ;;  %v784_v46 = vmax.f32 %v776_v40, 0.0  ;;  %v2203_v40 = vld [vmem:[%s2343_s3 + $0x28] sm:$0xff] }
 0x123   : > { %v629_v23 = vpop.f32.mrf.mxu0  ;;  %v718_v56 = vpop.f32.mrf.mxu1 }
 0x124   : > { %v778_v36 = vadd.f32 %v2122_v27, %v629_v23  ;;  %v785_v45 = vmax.f32 %v777_v38, 0.0 }
 0x125   : > { %v633_v25 = vpop.f32.mrf.mxu0  ;;  %v722_v59 = vpop.f32.mrf.mxu1 }
 0x126   : > { %v779_v34 = vadd.f32 %v2124_v29, %v633_v25  ;;  %v786_v44 = vmax.f32 %v778_v36, 0.0 }
 0x127   : > { %v635_v26 = vpop.f32.mrf.mxu0  ;;  %v724_v63 = vpop.f32.mrf.mxu1 }
 0x128   : > { %v780_v32 = vadd.f32 %v2124_v29, %v635_v26  ;;  %v787_v43 = vmax.f32 %v779_v34, 0.0  ;;  %v1161_v26 = vadd.f32 %v2124_v29, %v724_v63 }
 0x129   : > { %v639_v28 = vpop.f32.mrf.mxu0  ;;  %v728_v4 = vpop.f32.mrf.mxu1 }
 0x12a   : > { %v781_v30 = vadd.f32 %v2120_v24, %v639_v28  ;;  %v788_v41 = vmax.f32 %v780_v32, 0.0  ;;  %v1162_v23 = vadd.f32 %v2120_v24, %v728_v4  ;;  %v2191_v32 = vld [vmem:[%s2343_s3 + $0x20] sm:$0xff]  ;;  %v1169_v38 = vmax.f32 %v1161_v26, 0.0 }
 0x12b   : > { %v641_v31 = vpop.f32.mrf.mxu0  ;;  %v730_v14 = vpop.f32.mrf.mxu1 }
 0x12c   : > { %v782_v33 = vadd.f32 %v2120_v24, %v641_v31  ;;  %v789_v39 = vmax.f32 %v781_v30, 0.0  ;;  %v1163_v21 = vadd.f32 %v2120_v24, %v730_v14  ;;  %v1160_v30 = vadd.f32 %v2124_v29, %v722_v59 }
 0x12d   : > { %v1158_v24 = vadd.f32 %v2122_v27, %v716_v54  ;;  %v1170_v36 = vmax.f32 %v1162_v23, 0.0  ;;  %v1156_v29 = vadd.f32 %v2130_v35, %v710_v52  ;;  %v2238_v54 = vpop.permute.xlu1 %933 }
 0x12e   : > { %v790_v37 = vmax.f32 %v782_v33, 0.0  ;;  %v1159_v33 = vadd.f32 %v2122_v27, %v718_v56  ;;  %v1171_v34 = vmax.f32 %v1163_v21, 0.0 }
 0x130   : > { %848 = vmatprep.subr.mxu0 %v790_v37  ;;  %v1157_v37 = vadd.f32 %v2130_v35, %v712_v53  ;;  %v1167_v27 = vmax.f32 %v1159_v33, 0.0  ;;  %v2211_v35 = vld [vmem:[%s2343_s3 + $0x30] sm:$0xff]  ;;  %v2236_v53 = vpop.permute.xlu0 %938 }
 0x131   : > { %849 = vmatpush1.msra.mxu0 %v789_v39  ;;  %v1168_v39 = vmax.f32 %v1160_v30, 0.0 }
 0x132   : > { %850 = vmatprep.subr.mxu0 %v788_v41  ;;  %v1166_v41 = vmax.f32 %v1158_v24, 0.0  ;;  %v1165_v42 = vmax.f32 %v1157_v37, 0.0 }
 0x133   : > { %851 = vmatpush1.msra.mxu0 %v787_v43  ;;  %v1164_v43 = vmax.f32 %v1156_v29, 0.0 }
 0x134   : > { %852 = vmatprep.subr.mxu0 %v786_v44  ;;  %v2219_v44 = vld [vmem:[%s2343_s3 + $0x38] sm:$0xff] }
 0x135   : > { %853 = vmatpush1.msra.mxu0 %v785_v45 }
 0x136   : > { %854 = vmatprep.subr.mxu0 %v784_v46 }
 0x137   : > { %855 = vmatpush1.msra.mxu0 %v783_v47 }
 0x138   : > { %1609 = vmatmul.mubr.msk.f32.vlgmr.msra.gmra.mxu0 %vm811_vm1, %v2139_v48 }
 0x139   : > { %894 = vmatprep.mubr.f32.mxu0 %v1820_v19 }
 0x13c   : > { %1610 = vmatmul.mubr.msk.f32.gmra.mxu0 %vm811_vm1, %v2147_v49 }
 0x13d   : > { %900 = vmatprep.mubr.f32.mxu0 %v1820_v19 }
 0x140   : > { %1611 = vmatmul.mubr.msk.f32.gmra.mxu0 %vm811_vm1, %v2155_v50 }
 0x141   : > { %906 = vmatprep.mubr.f32.mxu0 %v1820_v19 }
 0x144   : > { %1612 = vmatmul.mubr.msk.f32.gmra.mxu0 %vm811_vm1, %v2163_v51 }
 0x145   : > { %1126 = vmatprep.mubr.f32.mxu0 %v1820_v19 }
 0x1f8   : > { %v890_v55 = vpop.f32.mrf.mxu0 }
 0x1f9   : > { %v891_v1 = vadd.f32 %v890_v55, %v2179_v13 }
 0x1fa   : > { %v892_v57 = vpop.f32.mrf.mxu0 }
 0x1fb   : > { %v893_v17 = vadd.f32 %v892_v57, %v2179_v13  ;;  %v913_v31 = vmax.f32 %v891_v1, 0.0  ;;  %v2255_v1 = vld [vmem:[%s2345_s5] sm:$0x1] }
 0x1fc   : > { %v896_v58 = vpop.f32.mrf.mxu0 }
 0x1fd   : > { %v897_v15 = vadd.f32 %v896_v58, %v2175_v9  ;;  %v914_v28 = vmax.f32 %v893_v17, 0.0  ;;  %v2243_v58 = vpop.permute.xlu0 %928 }
 0x1fe   : > { %v898_v60 = vpop.f32.mrf.mxu0 }
 0x1ff   : > { %v899_v11 = vadd.f32 %v898_v60, %v2175_v9  ;;  %v915_v25 = vmax.f32 %v897_v15, 0.0 }
 0x200   : > { %v902_v61 = vpop.f32.mrf.mxu0 }
 0x201   : > { %v903_v10 = vadd.f32 %v902_v61, %v2170_v2  ;;  %v916_v22 = vmax.f32 %v899_v11, 0.0 }
 0x202   : > { %v904_v0 = vpop.f32.mrf.mxu0 }
 0x203   : > { %v905_v7 = vadd.f32 %v904_v0, %v2170_v2  ;;  %v917_v20 = vmax.f32 %v903_v10, 0.0  ;;  %v2247_v0 = vpop.permute.xlu1 %923 }
 0x204   : > { %v908_v3 = vpop.f32.mrf.mxu0 }
 0x205   : > { %v909_v5 = vadd.f32 %v908_v3, %v2168_v62  ;;  %v918_v18 = vmax.f32 %v905_v7, 0.0 }
 0x206   : > { %v910_v6 = vpop.f32.mrf.mxu0 }
 0x207   : > { %v911_v8 = vadd.f32 %v910_v6, %v2168_v62  ;;  %v919_v16 = vmax.f32 %v909_v5, 0.0 }
 0x209   : > { %v920_v12 = vmax.f32 %v911_v8, 0.0 }
 0x20b   : > { %977 = vmatprep.subr.mxu1 %v920_v12 }
 0x20c   : > { %978 = vmatpush1.msra.mxu1 %v919_v16 }
 0x20d   : > { %979 = vmatprep.subr.mxu1 %v918_v18 }
 0x20e   : > { %980 = vmatpush1.msra.mxu1 %v917_v20 }
 0x20f   : > { %981 = vmatprep.subr.mxu1 %v916_v22 }
 0x210   : > { %982 = vmatpush1.msra.mxu1 %v915_v25 }
 0x211   : > { %983 = vmatprep.subr.mxu1 %v914_v28 }
 0x212   : > { %984 = vmatpush1.msra.mxu1 %v913_v31 }
 0x213   : > { %1613 = vmatmul.mubr.msk.f32.vlgmr.msra.gmra.mxu1 %vm811_vm1, %v2191_v32  ;;  %1196 = vmatprep.subr.mxu1 %v1171_v34 }
 0x214   : > { %1197 = vmatpush1.msra.mxu1 %v1170_v36  ;;  %1023 = vmatprep.mubr.f32.mxu1 %v1820_v19 }
 0x215   : > { %1198 = vmatprep.subr.mxu1 %v1169_v38 }
 0x216   : > { %1199 = vmatpush1.msra.mxu1 %v1168_v39 }
 0x217   : > { %1614 = vmatmul.mubr.msk.f32.gmra.mxu1 %vm811_vm1, %v2203_v40  ;;  %1200 = vmatprep.subr.mxu1 %v1167_v27 }
 0x218   : > { %1201 = vmatpush1.msra.mxu1 %v1166_v41  ;;  %1029 = vmatprep.mubr.f32.mxu1 %v1820_v19 }
 0x219   : > { %1202 = vmatprep.subr.mxu1 %v1165_v42  ;;  %v1053_v42 = vpop.permute.xlu0 %1052 }
 0x21a   : > { %1203 = vmatpush1.msra.mxu1 %v1164_v43 }
 0x21b   : > { %1615 = vmatmul.mubr.msk.f32.gmra.mxu1 %vm811_vm1, %v2211_v35 }
 0x21c   : > { %1035 = vmatprep.mubr.f32.mxu1 %v1820_v19 }
 0x21f   : > { %1616 = vmatmul.mubr.msk.f32.gmra.mxu1 %vm811_vm1, %v2219_v44 }
 0x220   : > { %1236 = vmatprep.mubr.f32.mxu1 %v1820_v19 }
 0x223   : > { %1618 = vmatmul.mubr.msk.f32.vlgmr.msra.gmra.mxu1 %vm811_vm1, %v2139_v48 }
 0x224   : > { %1242 = vmatprep.mubr.f32.mxu1 %v1820_v19 }
 0x227   : > { %1619 = vmatmul.mubr.msk.f32.gmra.mxu1 %vm811_vm1, %v2147_v49 }
 0x228   : > { %1248 = vmatprep.mubr.f32.mxu1 %v1820_v19 }
 0x22b   : > { %1620 = vmatmul.mubr.msk.f32.gmra.mxu1 %vm811_vm1, %v2155_v50 }
 0x22c   : > { %1254 = vmatprep.mubr.f32.mxu1 %v1820_v19 }
 0x22f   : > { %1621 = vmatmul.mubr.msk.f32.gmra.mxu1 %vm811_vm1, %v2163_v51 }
 0x230   : > { %1430 = vmatprep.mubr.f32.mxu1 %v1820_v19 }
 0x2d3   : > { %v1019_v45 = vpop.f32.mrf.mxu1 }
 0x2d4   : > { %v1020_v8 = vadd.f32 %v1019_v45, %v2247_v0 }
 0x2d5   : > { %v1021_v46 = vpop.f32.mrf.mxu1 }
 0x2d6   : > { %v1022_v6 = vadd.f32 %v1021_v46, %v2247_v0  ;;  %v1042_v17 = vmax.f32 %v1020_v8, 0.0 }
 0x2d7   : > { %v1025_v47 = vpop.f32.mrf.mxu1 }
 0x2d8   : > { %v1026_v3 = vadd.f32 %v1025_v47, %v2243_v58  ;;  %v1043_v16 = vmax.f32 %v1022_v6, 0.0 }
 0x2d9   : > { %v1027_v48 = vpop.f32.mrf.mxu1 }
 0x2da   : > { %v1028_v61 = vadd.f32 %v1027_v48, %v2243_v58  ;;  %v1044_v14 = vmax.f32 %v1026_v3, 0.0 }
 0x2db   : > { %v1031_v52 = vpop.f32.mrf.mxu1 }
 0x2dc   : > { %v1032_v59 = vadd.f32 %v1031_v52, %v2238_v54  ;;  %v1045_v12 = vmax.f32 %v1028_v61, 0.0 }
 0x2dd   : > { %v1033_v49 = vpop.f32.mrf.mxu1 }
 0x2de   : > { %v1034_v57 = vadd.f32 %v1033_v49, %v2238_v54  ;;  %v1046_v10 = vmax.f32 %v1032_v59, 0.0 }
 0x2df   : > { %v1037_v55 = vpop.f32.mrf.mxu1 }
 0x2e0   : > { %v1038_v50 = vadd.f32 %v1037_v55, %v2236_v53  ;;  %v1047_v7 = vmax.f32 %v1034_v57, 0.0 }
 0x2e1   : > { %v1039_v56 = vpop.f32.mrf.mxu1 }
 0x2e2   : > { %v1040_v51 = vadd.f32 %v1039_v56, %v2236_v53  ;;  %v1048_v4 = vmax.f32 %v1038_v50, 0.0 }
 0x2e3   : > { %v1238_v60 = vpop.f32.mrf.mxu1 }
 0x2e4   : > { %v1049_v63 = vmax.f32 %v1040_v51, 0.0  ;;  %v1239_v37 = vadd.f32 %v1238_v60, %v2179_v13 }
 0x2e5   : > { %v1240_v5 = vpop.f32.mrf.mxu1 }
 0x2e6   : > { %1086 = vmatprep.subr.mxu0 %v1049_v63  ;;  %v1241_v24 = vadd.f32 %v1240_v5, %v2179_v13 }
 0x2e7   : > { %1087 = vmatpush1.msra.mxu0 %v1048_v4  ;;  %v1244_v11 = vpop.f32.mrf.mxu1 }
 0x2e8   : > { %1088 = vmatprep.subr.mxu0 %v1047_v7  ;;  %v1245_v33 = vadd.f32 %v1244_v11, %v2175_v9 }
 0x2e9   : > { %1089 = vmatpush1.msra.mxu0 %v1046_v10  ;;  %v1246_v15 = vpop.f32.mrf.mxu1 }
 0x2ea   : > { %1090 = vmatprep.subr.mxu0 %v1045_v12  ;;  %v1247_v30 = vadd.f32 %v1246_v15, %v2175_v9  ;;  %v1263_v39 = vmax.f32 %v1245_v33, 0.0  ;;  %v1055_v9 = vlaneseq }
 0x2eb   : > { %1091 = vmatpush1.msra.mxu0 %v1044_v14  ;;  %v1250_v18 = vpop.f32.mrf.mxu1 }
 0x2ec   : > { %1092 = vmatprep.subr.mxu0 %v1043_v16  ;;  %v1251_v28 = vadd.f32 %v1250_v18, %v2170_v2  ;;  %v1264_v29 = vmax.f32 %v1247_v30, 0.0  ;;  %v1056_v13 = vshrl.u32 %v1055_v9, 7  ;;  %vm2282_vm2 = vcmp.lt.s32.totalorder %v1055_v9, 256 }
 0x2ed   : > { %1093 = vmatpush1.msra.mxu0 %v1042_v17  ;;  %v1252_v20 = vpop.f32.mrf.mxu1 }
 0x2ee   : > { %1617 = vmatmul.mubr.msk.f32.vlgmr.msra.gmra.mxu0 %vm811_vm1, %v2255_v1  ;;  %v1253_v25 = vadd.f32 %v1252_v20, %v2170_v2  ;;  %v1265_v38 = vmax.f32 %v1251_v28, 0.0  ;;  %v1261_v2 = vmax.f32 %v1239_v37, 0.0  ;;  %v1057_v41 = vsub.s32 0, %v1056_v13 }
 0x2ef   : > { %v1256_v21 = vpop.f32.mrf.mxu1  ;;  %1333 = vmatprep.mubr.f32.mxu0 %v1820_v19 }
 0x2f0   : > { %v1257_v22 = vadd.f32 %v1256_v21, %v2168_v62  ;;  %v1266_v36 = vmax.f32 %v1253_v25, 0.0 }
 0x2f1   : > { %v1258_v23 = vpop.f32.mrf.mxu1 }
 0x2f2   : > { %v1259_v26 = vadd.f32 %v1258_v23, %v2168_v62  ;;  %v1267_v34 = vmax.f32 %v1257_v22, 0.0  ;;  %v1262_v62 = vmax.f32 %v1241_v24, 0.0 }
 0x2f4   : > { %v1268_v31 = vmax.f32 %v1259_v26, 0.0 }
 0x2f6   : > { %1293 = vmatprep.subr.mxu0 %v1268_v31 }
 0x2f7   : > { %1294 = vmatpush1.msra.mxu0 %v1267_v34 }
 0x2f8   : > { %1295 = vmatprep.subr.mxu0 %v1266_v36 }
 0x2f9   : > { %1296 = vmatpush1.msra.mxu0 %v1265_v38 }
 0x2fa   : > { %1297 = vmatprep.subr.mxu0 %v1264_v29 }
 0x2fb   : > { %1298 = vmatpush1.msra.mxu0 %v1263_v39 }
 0x2fc   : > { %1299 = vmatprep.subr.mxu0 %v1262_v62 }
 0x2fd   : > { %1300 = vmatpush1.msra.mxu0 %v1261_v2 }
 0x2fe   : > { %1622 = vmatmul.mubr.msk.f32.vlgmr.msra.gmra.mxu0 %vm811_vm1, %v2191_v32  ;;  %v1821_v32 = vmov 1966171168  }
 0x2ff   : > { %1339 = vmatprep.mubr.f32.mxu0 %v1820_v19  ;;  %v1137_v27 = vunpack.c.l.s4 %v1821_v32 }
 0x301   : > { %v1138_v43 = vunpack.c.0.s8 %v1137_v27 }
 0x302   : > { %1623 = vmatmul.mubr.msk.f32.gmra.mxu0 %vm811_vm1, %v2203_v40  ;;  %v1058_v40 = vrot.slane %v1053_v42, %v1057_v41 }
 0x303   : > { %1345 = vmatprep.mubr.f32.mxu0 %v1820_v19  ;;  %v1141_v47 = vsub.s32 %v1138_v43, %v1056_v13 }
 0x306   : > { %1624 = vmatmul.mubr.msk.f32.gmra.mxu0 %vm811_vm1, %v2211_v35 }
 0x307   : > { %1351 = vmatprep.mubr.f32.mxu0 %v1820_v19 }
 0x30a   : > { %1625 = vmatmul.mubr.msk.f32.gmra.mxu0 %vm811_vm1, %v2219_v44 }
 0x3ae   : > { %v1128_v45 = vpop.f32.mrf.mxu0 }
 0x3af   : > { %v1129_v48 = vadd.f32 %v1128_v45, %v1058_v40 }
 0x3b0   : > { %v1130_v46 = vpop.f32.mrf.mxu0 }
 0x3b1   : > { %v1131_v35 = vadd.f32 %v1130_v46, %v1058_v40 }
 0x3b3   : > { %v1135_v52 = vcombine.low %v1129_v48, %v1131_v35 }
 0x3b5   : > { %v1142_v19 = vrot.slane %v1135_v52, %v1141_v47 }
 0x3b7   : > { %v1149_v49 = vrot.slane %v1142_v19, %v1141_v47 }
 0x3b9   : > { %1155 = vst.msk [vmem:[%s2286_s30] sm:$0x3] %vm2282_vm2, %v1149_v49 }
 0x3be   : > { %v1335_v55 = vpop.f32.mrf.mxu0 }
 0x3bf   : > { %v1336_v14 = vadd.f32 %v1335_v55, %v2247_v0 }
 0x3c0   : > { %v1337_v50 = vpop.f32.mrf.mxu0 }
 0x3c1   : > { %v1338_v11 = vadd.f32 %v1337_v50, %v2247_v0  ;;  %v1358_v17 = vmax.f32 %v1336_v14, 0.0 }
 0x3c2   : > { %v1341_v56 = vpop.f32.mrf.mxu0 }
 0x3c3   : > { %v1342_v8 = vadd.f32 %v1341_v56, %v2243_v58 }
 0x3c4   : > { %v1343_v57 = vpop.f32.mrf.mxu0 }
 0x3c5   : > { %v1344_v6 = vadd.f32 %v1343_v57, %v2243_v58 }
 0x3c6   : > { %v1347_v51 = vpop.f32.mrf.mxu0 }
 0x3c7   : > { %v1348_v5 = vadd.f32 %v1347_v51, %v2238_v54  ;;  %v1361_v16 = vmax.f32 %v1344_v6, 0.0 }
 0x3c8   : > { %v1349_v59 = vpop.f32.mrf.mxu0 }
 0x3c9   : > { %v1350_v3 = vadd.f32 %v1349_v59, %v2238_v54  ;;  %v1362_v15 = vmax.f32 %v1348_v5, 0.0  ;;  %v1359_v54 = vmax.f32 %v1338_v11, 0.0 }
 0x3ca   : > { %v1353_v60 = vpop.f32.mrf.mxu0 }
 0x3cb   : > { %v1354_v61 = vadd.f32 %v1353_v60, %v2236_v53  ;;  %v1363_v12 = vmax.f32 %v1350_v3, 0.0 }
 0x3cc   : > { %v1355_v63 = vpop.f32.mrf.mxu0 }
 0x3cd   : > { %v1356_v4 = vadd.f32 %v1355_v63, %v2236_v53  ;;  %v1364_v10 = vmax.f32 %v1354_v61, 0.0  ;;  %v1360_v53 = vmax.f32 %v1342_v8, 0.0 }
 0x3cf   : > { %v1365_v7 = vmax.f32 %v1356_v4, 0.0 }
 0x3d1   : > { %1390 = vmatprep.subr.mxu1 %v1365_v7 }
 0x3d2   : > { %1391 = vmatpush1.msra.mxu1 %v1364_v10 }
 0x3d3   : > { %1392 = vmatprep.subr.mxu1 %v1363_v12 }
 0x3d4   : > { %1393 = vmatpush1.msra.mxu1 %v1362_v15 }
 0x3d5   : > { %1394 = vmatprep.subr.mxu1 %v1361_v16 }
 0x3d6   : > { %1395 = vmatpush1.msra.mxu1 %v1360_v53 }
 0x3d7   : > { %1396 = vmatprep.subr.mxu1 %v1359_v54 }
 0x3d8   : > { %1397 = vmatpush1.msra.mxu1 %v1358_v17 }
 0x3d9   : > { %1626 = vmatmul.mubr.msk.f32.vlgmr.msra.gmra.mxu1 %vm811_vm1, %v2255_v1 }
 0x499   : > { %v1432_v58 = vpop.f32.mrf.mxu1 }
 0x49a   : > { %v1433_v18 = vadd.f32 %v1432_v58, %v1058_v40 }
 0x49b   : > { %v1434_v0 = vpop.f32.mrf.mxu1 }
 0x49c   : > { %v1435_v20 = vadd.f32 %v1434_v0, %v1058_v40 }
 0x49e   : > { %v1439_v21 = vcombine.low %v1433_v18, %v1435_v20 }
 0x4a0   : > { %v1446_v22 = vrot.slane %v1439_v21, %v1141_v47 }
 0x4a2   : > { %v1453_v23 = vrot.slane %v1446_v22, %v1141_v47 }
 0x4a4   : > { %1455 = vst.msk [vmem:[%s2286_s30 + $0x2] sm:$0x3] %vm2282_vm2, %v1453_v23 }
 0x4a5   : > { %1770 = shalt.err (!%p1767_p3)
}
 0x4a6   : > { %s1771_s14 = scalar_lea.hbm %s1469_s17, 64  ;;  %s1775_s24 = scalar_lea.hbm %s2347_s7, 128 }
 0x4a7   : > { %p1772_p4 = scmp.ne.s32.totalorder %s1469_s17, %s1771_s14  ;;  %p1776_p9 = scmp.lt.s32.totalorder %s1469_s17, %s2347_s7 }
 0x4a8   : > { %p1777_p10 = scmp.lt.s32.totalorder %s1775_s24, %s1771_s14 }
 0x4a9   : > { %p1773_p7 = pnand %p1772_p4, %p1901_p5 }
 0x4aa   : > { %p1778_p11 = por %p1777_p10, %p1776_p9 }
 0x4ab   : > { %p1774_p8 = pneg %p1773_p7 }
 0x4ad   : > { %p1779_p12 = pnand %p1778_p11, %p1774_p8 }
 0x4af   : > { %1782 = shalt.err (!%p1779_p12)
}
 0x4b0   : > { %1713 = dma.vmem_to_hbm [thread:$0]  (%p1901_p5), %s1472_s9, 64, %s1469_s17, %s1457_s18  }
 0x4b1 PF: > { %p1719_p13 = scmp.ge.s32.totalorder %s1817_s29, 2  ;;  %s1483_s30 = sand.u32 1, %s1805_s26  }
 0x4b2   : > { %s1484_s15 = scalar_lea.sflag [#allocation4], %s1483_s30 }
 0x4b3   : > { %p1716_p0 = pnand %p1719_p13, %p1905_p6 }
 0x4b5   : > { %p1717_p1 = pneg %p1716_p0 }
 0x4b7   : > { %1800 = dma.done.wait (%p1717_p1), %s1484_s15, 64  }
 0x4b8   : > { %1802 = vsyncadd (%p1717_p1), %s1484_s15, 4294967232  ;;  %p19_p2 = scmp.ge.s32.totalorder %s1889_s8, 4   ;;  %s2352_s26 = smov %s1809_s27 }
 0x4b9   : > { %s2353_s27 = smov %s1813_s28  ;;  %s2354_s28 = smov %s1899_s11 }
 0x4ba   : > { %s2355_s29 = smov %s1889_s8  ;;  %21 = sbr.rel (!%p19_p2) target bundleno = 6 (0x6), region = 83 }
 0x4bf   :  { %1489 = vsyncpa [#allocation4], 1 }
 0x4c0   :  { %1491 = vsyncpa [#allocation4 + $0x1], 1 }

</bundles_post_ra>
